<compile_context>
chip_gen: v6e
topology: v6e:2x2x1
jax: 0.10.0
libtpu: 0.0.40
codegen_flags: <defaults>
</compile_context>

<pallas_src>
import jax
import jax.numpy as jnp
from jax.experimental import pallas as pl
from jax.experimental.pallas import tpu as pltpu


def _round_up(x, m):
    return (x + m - 1) // m * m


def deeponet_kernel(v_ref, g_ref,
                    wb1_ref, bb1_ref, wb2_ref, bb2_ref,
                    wt1_ref, bt1_ref, wt2_ref, bt2_ref,
                    bias_ref, o_ref):
    # Branch MLP: (TM, Fb) bf16 -> (TM, H) f32 -> tanh -> bf16 -> (TM, P) f32
    hb = jnp.tanh(
        jnp.dot(v_ref[...], wb1_ref[...], preferred_element_type=jnp.float32)
        + bb1_ref[...]
    )
    yb = (
        jnp.dot(hb.astype(jnp.bfloat16), wb2_ref[...],
                preferred_element_type=jnp.float32)
        + bb2_ref[...]
    )
    # Trunk MLP: (TM, Ft) bf16 -> (TM, H) f32 -> tanh -> bf16 -> (TM, P) f32
    ht = jnp.tanh(
        jnp.dot(g_ref[...], wt1_ref[...], preferred_element_type=jnp.float32)
        + bt1_ref[...]
    )
    yt = (
        jnp.dot(ht.astype(jnp.bfloat16), wt2_ref[...],
                preferred_element_type=jnp.float32)
        + bt2_ref[...]
    )
    prod = yb * yt                                            # (TM, P) f32
    # Reduce over P on the MXU (keeps the XLU slot free); the (TM, 1) column is
    # already in the natural sublane-major layout, so store it directly.
    ones = jnp.ones((prod.shape[-1], 1), jnp.float32)
    out = jnp.dot(prod, ones, preferred_element_type=jnp.float32) + bias_ref[0, 0]
    o_ref[...] = out.astype(o_ref.dtype)


def deeponet_forward(values, grid, params):
    """values: (B, N, Fb), grid: (B, N, Ft) -> (B, N) float32."""
    B, N, Fb = values.shape
    _, _, Ft = grid.shape
    M = B * N

    # Activations and weight matrices feed the MXU in bf16; biases stay f32
    # because they are added to the f32 accumulators.
    v2d = values.reshape(M, Fb).astype(jnp.bfloat16)
    g2d = grid.reshape(M, Ft).astype(jnp.bfloat16)
    wb1 = params["wb1"].astype(jnp.bfloat16)
    wb2 = params["wb2"].astype(jnp.bfloat16)
    wt1 = params["wt1"].astype(jnp.bfloat16)
    wt2 = params["wt2"].astype(jnp.bfloat16)
    bb1, bb2 = params["bb1"], params["bb2"]
    bt1, bt2 = params["bt1"], params["bt2"]
    H = wb1.shape[1]
    P = wb2.shape[1]

    # Row-tile size: aim for >= 2 grid steps (both v7x TensorCores busy), tiles a
    # multiple of 128 rows, capped at 2048 rows (amortizes the ~0.35us/step
    # overhead; x tile + f32 intermediates stay well under the VMEM budget).
    # For tiny problems don't exceed the row count (rounded to a sublane group).
    TM = min(2048, max(128, _round_up(pl.cdiv(M, 2), 128)))
    TM = min(TM, _round_up(M, 8))
    num_tiles = pl.cdiv(M, TM)

    def resident(shape):
        # Fetched once (constant index_map); single-buffered to save VMEM.
        return pl.BlockSpec(shape, lambda i: (0, 0), pipeline_mode=pl.Buffered(1))

    cost = pl.CostEstimate(
        flops=2 * M * (Fb * H + Ft * H + 2 * H * P + P),
        transcendentals=2 * M * H,
        bytes_accessed=(
            2 * M * (Fb + Ft)                       # bf16 activations in
            + 2 * (Fb * H + Ft * H + 2 * H * P)     # bf16 weights
            + 4 * (2 * H + 2 * P + 1)               # f32 biases + scalar
            + 4 * M                                 # f32 output
        ),
    )

    out_col = pl.pallas_call(
        deeponet_kernel,
        out_shape=jax.ShapeDtypeStruct((M, 1), jnp.float32),
        grid=(num_tiles,),
        in_specs=[
            pl.BlockSpec((TM, Fb), lambda i: (i, 0)),            # values tile
            pl.BlockSpec((TM, Ft), lambda i: (i, 0)),            # grid tile
            resident((Fb, H)),                                   # branch W1
            resident((1, H)),                                    # branch b1
            resident((H, P)),                                    # branch W2
            resident((1, P)),                                    # branch b2
            resident((Ft, H)),                                   # trunk W1
            resident((1, H)),                                    # trunk b1
            resident((H, P)),                                    # trunk W2
            resident((1, P)),                                    # trunk b2
            pl.BlockSpec(memory_space=pltpu.MemorySpace.SMEM),   # scalar bias b
        ],
        out_specs=pl.BlockSpec((TM, 1), lambda i: (i, 0)),
        compiler_params=pltpu.CompilerParams(
            dimension_semantics=("parallel",),
            vmem_limit_bytes=64 * 1024 * 1024,
        ),
        cost_estimate=cost,
    )(v2d, g2d, wb1, bb1, wb2, bb2, wt1, bt1, wt2, bt2, params["b"])

    return out_col.reshape(B, N)


def make_params(key, f_branch, f_trunk, hidden, p):
    ks = jax.random.split(key, 8)
    scale = 0.1
    return {
        "wb1": scale * jax.random.normal(ks[0], (f_branch, hidden), jnp.float32),
        "bb1": scale * jax.random.normal(ks[1], (1, hidden), jnp.float32),
        "wb2": scale * jax.random.normal(ks[2], (hidden, p), jnp.float32),
        "bb2": scale * jax.random.normal(ks[3], (1, p), jnp.float32),
        "wt1": scale * jax.random.normal(ks[4], (f_trunk, hidden), jnp.float32),
        "bt1": scale * jax.random.normal(ks[5], (1, hidden), jnp.float32),
        "wt2": scale * jax.random.normal(ks[6], (hidden, p), jnp.float32),
        "bt2": scale * jax.random.normal(ks[7], (1, p), jnp.float32),
        # self.b is initialized to 0.0 in the PyTorch module
        "b": jnp.zeros((1, 1), jnp.float32),
    }


def deeponet_ref(values, grid, params):
    """Pure-JAX f32 reference of the same forward pass."""
    def mlp(x, w1, b1, w2, b2):
        return jnp.tanh(x @ w1 + b1) @ w2 + b2

    branch = mlp(values, params["wb1"], params["bb1"], params["wb2"], params["bb2"])
    trunk = mlp(grid, params["wt1"], params["bt1"], params["wt2"], params["bt2"])
    return jnp.einsum("abc,abc->ab", branch, trunk) + params["b"][0, 0]


if __name__ == "__main__":
    key = jax.random.PRNGKey(0)
    k_v, k_g, k_p = jax.random.split(key, 3)

    B, N = 2, 8          # batch, query points
    F_BRANCH = 16        # sensor features per point fed to branch net
    F_TRUNK = 2          # coordinate dim fed to trunk net
    HIDDEN = 32
    P = 32               # shared latent dim reduced by the einsum

    values = jax.random.normal(k_v, (B, N, F_BRANCH), jnp.float32)
    grid = jax.random.normal(k_g, (B, N, F_TRUNK), jnp.float32)
    params = make_params(k_p, F_BRANCH, F_TRUNK, HIDDEN, P)

    out = deeponet_forward(values, grid, params)
    out = jax.block_until_ready(out)

    ref = deeponet_ref(values, grid, params)
    assert out.shape == (B, N)
    # bf16 matmul path -> relaxed tolerance vs. the f32 reference.
    assert jnp.allclose(out, ref, atol=1e-2, rtol=1e-2), "mismatch vs JAX reference"

    print("KERNEL_OK")
</pallas_src>

<mosaic_0001>
module attributes {stable_mosaic.version = 11 : i64} {
  func.func @deeponet_kernel(%arg0: i32, %arg1: memref<16x16xbf16, #tpu.memory_space<vmem>>, %arg2: memref<16x2xbf16, #tpu.memory_space<vmem>>, %arg3: memref<16x32xbf16, #tpu.memory_space<vmem>>, %arg4: memref<1x32xf32, #tpu.memory_space<vmem>>, %arg5: memref<32x32xbf16, #tpu.memory_space<vmem>>, %arg6: memref<1x32xf32, #tpu.memory_space<vmem>>, %arg7: memref<2x32xbf16, #tpu.memory_space<vmem>>, %arg8: memref<1x32xf32, #tpu.memory_space<vmem>>, %arg9: memref<32x32xbf16, #tpu.memory_space<vmem>>, %arg10: memref<1x32xf32, #tpu.memory_space<vmem>>, %arg11: memref<1x1xf32, #tpu.memory_space<smem>>, %arg12: memref<16x1xf32, #tpu.memory_space<vmem>>) attributes {dimension_semantics = [#tpu.dimension_semantics<parallel>], iteration_bounds = array<i64: 1>, scalar_prefetch = 0 : i64, scratch_operands = 0 : i64, tpu.core_type = #tpu.core_type<tc>, window_params = [{transform_indices = @transform_0, window_bounds = array<i64: 16, 16>}, {transform_indices = @transform_1, window_bounds = array<i64: 16, 2>}, {pipeline_mode = #tpu.pipeline_mode<synchronous>, transform_indices = @transform_2, window_bounds = array<i64: 16, 32>}, {pipeline_mode = #tpu.pipeline_mode<synchronous>, transform_indices = @transform_3, window_bounds = array<i64: 1, 32>}, {pipeline_mode = #tpu.pipeline_mode<synchronous>, transform_indices = @transform_4, window_bounds = array<i64: 32, 32>}, {pipeline_mode = #tpu.pipeline_mode<synchronous>, transform_indices = @transform_5, window_bounds = array<i64: 1, 32>}, {pipeline_mode = #tpu.pipeline_mode<synchronous>, transform_indices = @transform_6, window_bounds = array<i64: 2, 32>}, {pipeline_mode = #tpu.pipeline_mode<synchronous>, transform_indices = @transform_7, window_bounds = array<i64: 1, 32>}, {pipeline_mode = #tpu.pipeline_mode<synchronous>, transform_indices = @transform_8, window_bounds = array<i64: 32, 32>}, {pipeline_mode = #tpu.pipeline_mode<synchronous>, transform_indices = @transform_9, window_bounds = array<i64: 1, 32>}, {transform_indices = @transform_10, window_bounds = array<i64: 1, 1>}, {transform_indices = @transform_11, window_bounds = array<i64: 16, 1>}]} {
    %c0 = arith.constant 0 : index
    %c0_0 = arith.constant 0 : index
    %0 = vector.load %arg1[%c0, %c0_0] : memref<16x16xbf16, #tpu.memory_space<vmem>>, vector<16x16xbf16>
    %c0_1 = arith.constant 0 : index
    %c0_2 = arith.constant 0 : index
    %1 = vector.load %arg3[%c0_1, %c0_2] : memref<16x32xbf16, #tpu.memory_space<vmem>>, vector<16x32xbf16>
    %cst = arith.constant dense<0.000000e+00> : vector<16x32xf32>
    %2 = tpu.matmul %0, %1, %cst {dimension_numbers = #tpu.dot_dimension_numbers<[1], [0], [0], [1], [0, 0, 1, 1], [], []>} : vector<16x16xbf16>, vector<16x32xbf16>, vector<16x32xf32> -> vector<16x32xf32>
    %c0_3 = arith.constant 0 : index
    %c0_4 = arith.constant 0 : index
    %3 = vector.load %arg4[%c0_3, %c0_4] : memref<1x32xf32, #tpu.memory_space<vmem>>, vector<1x32xf32>
    %4 = vector.broadcast %3 : vector<1x32xf32> to vector<16x32xf32>
    %5 = arith.addf %2, %4 : vector<16x32xf32>
    %6 = math.tanh %5 : vector<16x32xf32>
    %7 = arith.truncf %6 : vector<16x32xf32> to vector<16x32xbf16>
    %c0_5 = arith.constant 0 : index
    %c0_6 = arith.constant 0 : index
    %8 = vector.load %arg5[%c0_5, %c0_6] : memref<32x32xbf16, #tpu.memory_space<vmem>>, vector<32x32xbf16>
    %cst_7 = arith.constant dense<0.000000e+00> : vector<16x32xf32>
    %9 = tpu.matmul %7, %8, %cst_7 {dimension_numbers = #tpu.dot_dimension_numbers<[1], [0], [0], [1], [0, 0, 1, 1], [], []>} : vector<16x32xbf16>, vector<32x32xbf16>, vector<16x32xf32> -> vector<16x32xf32>
    %c0_8 = arith.constant 0 : index
    %c0_9 = arith.constant 0 : index
    %10 = vector.load %arg6[%c0_8, %c0_9] : memref<1x32xf32, #tpu.memory_space<vmem>>, vector<1x32xf32>
    %11 = vector.broadcast %10 : vector<1x32xf32> to vector<16x32xf32>
    %12 = arith.addf %9, %11 : vector<16x32xf32>
    %c0_10 = arith.constant 0 : index
    %c0_11 = arith.constant 0 : index
    %13 = vector.load %arg2[%c0_10, %c0_11] : memref<16x2xbf16, #tpu.memory_space<vmem>>, vector<16x2xbf16>
    %c0_12 = arith.constant 0 : index
    %c0_13 = arith.constant 0 : index
    %14 = vector.load %arg7[%c0_12, %c0_13] : memref<2x32xbf16, #tpu.memory_space<vmem>>, vector<2x32xbf16>
    %cst_14 = arith.constant dense<0.000000e+00> : vector<16x32xf32>
    %15 = tpu.matmul %13, %14, %cst_14 {dimension_numbers = #tpu.dot_dimension_numbers<[1], [0], [0], [1], [0, 0, 1, 1], [], []>} : vector<16x2xbf16>, vector<2x32xbf16>, vector<16x32xf32> -> vector<16x32xf32>
    %c0_15 = arith.constant 0 : index
    %c0_16 = arith.constant 0 : index
    %16 = vector.load %arg8[%c0_15, %c0_16] : memref<1x32xf32, #tpu.memory_space<vmem>>, vector<1x32xf32>
    %17 = vector.broadcast %16 : vector<1x32xf32> to vector<16x32xf32>
    %18 = arith.addf %15, %17 : vector<16x32xf32>
    %19 = math.tanh %18 : vector<16x32xf32>
    %20 = arith.truncf %19 : vector<16x32xf32> to vector<16x32xbf16>
    %c0_17 = arith.constant 0 : index
    %c0_18 = arith.constant 0 : index
    %21 = vector.load %arg9[%c0_17, %c0_18] : memref<32x32xbf16, #tpu.memory_space<vmem>>, vector<32x32xbf16>
    %cst_19 = arith.constant dense<0.000000e+00> : vector<16x32xf32>
    %22 = tpu.matmul %20, %21, %cst_19 {dimension_numbers = #tpu.dot_dimension_numbers<[1], [0], [0], [1], [0, 0, 1, 1], [], []>} : vector<16x32xbf16>, vector<32x32xbf16>, vector<16x32xf32> -> vector<16x32xf32>
    %c0_20 = arith.constant 0 : index
    %c0_21 = arith.constant 0 : index
    %23 = vector.load %arg10[%c0_20, %c0_21] : memref<1x32xf32, #tpu.memory_space<vmem>>, vector<1x32xf32>
    %24 = vector.broadcast %23 : vector<1x32xf32> to vector<16x32xf32>
    %25 = arith.addf %22, %24 : vector<16x32xf32>
    %26 = arith.mulf %12, %25 : vector<16x32xf32>
    %cst_22 = arith.constant 1.000000e+00 : f32
    %27 = vector.broadcast %cst_22 : f32 to vector<32x1xf32>
    %cst_23 = arith.constant dense<0.000000e+00> : vector<16x1xf32>
    %28 = tpu.matmul %26, %27, %cst_23 {dimension_numbers = #tpu.dot_dimension_numbers<[1], [0], [0], [1], [0, 0, 1, 1], [], []>} : vector<16x32xf32>, vector<32x1xf32>, vector<16x1xf32> -> vector<16x1xf32>
    %c0_24 = arith.constant 0 : index
    %c0_25 = arith.constant 0 : index
    %29 = memref.load %arg11[%c0_24, %c0_25] : memref<1x1xf32, #tpu.memory_space<smem>>
    %30 = vector.broadcast %29 : f32 to vector<16x1xf32>
    %31 = arith.addf %28, %30 : vector<16x1xf32>
    %c0_26 = arith.constant 0 : index
    %c0_27 = arith.constant 0 : index
    %32 = vector.load %arg12[%c0_26, %c0_27] : memref<16x1xf32, #tpu.memory_space<vmem>>, vector<16x1xf32>
    tpu.vector_store %arg12[%c0_26, %c0_27], %31 {strides = array<i32>} : memref<16x1xf32, #tpu.memory_space<vmem>>, vector<16x1xf32>,
    return
  }
  func.func @transform_0(%arg0: i32) -> (i32, i32) {
    %c0_i32 = arith.constant 0 : i32
    %c0_i32_0 = arith.constant 0 : i32
    return %arg0, %c0_i32 : i32, i32
  }
  func.func @transform_1(%arg0: i32) -> (i32, i32) {
    %c0_i32 = arith.constant 0 : i32
    %c0_i32_0 = arith.constant 0 : i32
    return %arg0, %c0_i32 : i32, i32
  }
  func.func @transform_2(%arg0: i32) -> (i32, i32) {
    %c0_i32 = arith.constant 0 : i32
    %c0_i32_0 = arith.constant 0 : i32
    %c0_i32_1 = arith.constant 0 : i32
    return %c0_i32, %c0_i32_0 : i32, i32
  }
  func.func @transform_3(%arg0: i32) -> (i32, i32) {
    %c0_i32 = arith.constant 0 : i32
    %c0_i32_0 = arith.constant 0 : i32
    %c0_i32_1 = arith.constant 0 : i32
    return %c0_i32, %c0_i32_0 : i32, i32
  }
  func.func @transform_4(%arg0: i32) -> (i32, i32) {
    %c0_i32 = arith.constant 0 : i32
    %c0_i32_0 = arith.constant 0 : i32
    %c0_i32_1 = arith.constant 0 : i32
    return %c0_i32, %c0_i32_0 : i32, i32
  }
  func.func @transform_5(%arg0: i32) -> (i32, i32) {
    %c0_i32 = arith.constant 0 : i32
    %c0_i32_0 = arith.constant 0 : i32
    %c0_i32_1 = arith.constant 0 : i32
    return %c0_i32, %c0_i32_0 : i32, i32
  }
  func.func @transform_6(%arg0: i32) -> (i32, i32) {
    %c0_i32 = arith.constant 0 : i32
    %c0_i32_0 = arith.constant 0 : i32
    %c0_i32_1 = arith.constant 0 : i32
    return %c0_i32, %c0_i32_0 : i32, i32
  }
  func.func @transform_7(%arg0: i32) -> (i32, i32) {
    %c0_i32 = arith.constant 0 : i32
    %c0_i32_0 = arith.constant 0 : i32
    %c0_i32_1 = arith.constant 0 : i32
    return %c0_i32, %c0_i32_0 : i32, i32
  }
  func.func @transform_8(%arg0: i32) -> (i32, i32) {
    %c0_i32 = arith.constant 0 : i32
    %c0_i32_0 = arith.constant 0 : i32
    %c0_i32_1 = arith.constant 0 : i32
    return %c0_i32, %c0_i32_0 : i32, i32
  }
  func.func @transform_9(%arg0: i32) -> (i32, i32) {
    %c0_i32 = arith.constant 0 : i32
    %c0_i32_0 = arith.constant 0 : i32
    %c0_i32_1 = arith.constant 0 : i32
    return %c0_i32, %c0_i32_0 : i32, i32
  }
  func.func @transform_10(%arg0: i32) -> (i32, i32) {
    %c0_i32 = arith.constant 0 : i32
    %c0_i32_0 = arith.constant 0 : i32
    %c0_i32_1 = arith.constant 0 : i32
    return %c0_i32, %c0_i32_0 : i32, i32
  }
  func.func @transform_11(%arg0: i32) -> (i32, i32) {
    %c0_i32 = arith.constant 0 : i32
    %c0_i32_0 = arith.constant 0 : i32
    return %arg0, %c0_i32 : i32, i32
  }
}

</mosaic_0001>

<bundles_post_ra>
// kernel: tpu_custom_call.1
= control target key start
LH: loop header
LB: loop body
LE: loop exit
PB: predicated region body
PF: predicated region fallthrough
CT: control target
= control target key end

     0   :  { %17 = vsyncpa [#allocation4], 0  ;;  %s724_s0 = inlined_call_operand.hbm [shape: bf16[16,16], index: 0, kind: input, shape index: {}]   ;;  %s725_s1 = inlined_call_operand.vmem [shape: bf16[16,2], index: 1, kind: input, shape index: {}]   ;;  %s726_s2 = inlined_call_operand.hbm [shape: bf16[16,32], index: 2, kind: input, shape index: {}]   ;;  %s727_s3 = inlined_call_operand.vmem [shape: f32[1,32], index: 3, kind: input, shape index: {}]   ;;  %s728_s4 = inlined_call_operand.vmem [shape: bf16[32,32], index: 4, kind: input, shape index: {}]   ;;  %s729_s5 = inlined_call_operand.vmem [shape: f32[1,32], index: 5, kind: input, shape index: {}]   ;;  %s730_s6 = inlined_call_operand.vmem [shape: bf16[2,32], index: 6, kind: input, shape index: {}]   ;;  %s731_s7 = inlined_call_operand.vmem [shape: f32[1,32], index: 7, kind: input, shape index: {}]   ;;  %s732_s8 = inlined_call_operand.hbm [shape: bf16[32,32], index: 8, kind: input, shape index: {}]   ;;  %s733_s9 = inlined_call_operand.vmem [shape: f32[1,32], index: 9, kind: input, shape index: {}]   ;;  %s734_s10 = inlined_call_operand.<no memory space> [shape: f32[1,1], index: 10, kind: input, shape index: {}]   ;;  %s735_s11 = inlined_call_operand.vmem [shape: f32[16,1], index: 11, kind: output, shape index: {}]  }
   0x1   :  { %18 = vsyncpa [#allocation6], 0  ;;  %s606_s17 = smov [#allocation5]   ;;  %s607_s19 = smov [#allocation3]  }
   0x2   :  { %s38_s18 = sshll.u32 %s606_s17, 4  ;;  %s24_s20 = sshll.u32 %s607_s19, 4  ;;  %s39_s18 = int_to_ptr.vmem [resolvable:$true] %s38_s18  ;;  %s25_s20 = int_to_ptr.vmem [resolvable:$true] %s24_s20 }
   0x3   :  { %s550_s21 = scalar_lea.vmem %s39_s18, 128  ;;  %p555_p1 = scmp.lt.s32.totalorder %s39_s18, %s39_s18 }
   0x4   :  { %p551_p0 = scmp.ne.s32.totalorder %s39_s18, %s550_s21  ;;  %p556_p2 = scmp.lt.s32.totalorder %s550_s21, %s550_s21 }
   0x6   :  { %p557_p3 = por %p556_p2, %p555_p1 }
   0x8   :  { %p558_p4 = pnand %p557_p3, %p551_p0 }
   0xa   :  { %561 = shalt.err (!%p558_p4)
}
   0xb   :  { %s608_s22 = smov 64   ;;  %s609_s23 = smov 4  }
   0xc   :  { %44 = dma.hbm_to_vmem [thread:$0]  %s726_s2, 128, %s39_s18, [#allocation6], %s608_s22, %s608_s22, %s609_s23  }
   0xd   :  { %s570_s26 = scalar_lea.vmem %s25_s20, 128  ;;  %p575_p6 = scmp.lt.s32.totalorder %s25_s20, %s25_s20 }
   0xe   :  { %p571_p5 = scmp.ne.s32.totalorder %s25_s20, %s570_s26  ;;  %p576_p7 = scmp.lt.s32.totalorder %s570_s26, %s570_s26 }
  0x10   :  { %p577_p8 = por %p576_p7, %p575_p6 }
  0x12   :  { %p578_p9 = pnand %p577_p8, %p571_p5 }
  0x14   :  { %581 = shalt.err (!%p578_p9)
}
  0x15   :  { %30 = dma.hbm_to_vmem [thread:$0]  %s724_s0, 128, %s25_s20, [#allocation4], %s608_s22, %s608_s22, %s609_s23  }
  0x16   :  { %s610_s29 = smov [#allocation7]  }
  0x17   :  { %s60_s30 = sshll.u32 %s610_s29, 4  ;;  %s61_s30 = int_to_ptr.vmem [resolvable:$true] %s60_s30 }
  0x18   :  { %s590_s12 = scalar_lea.vmem %s61_s30, 256  ;;  %p595_p11 = scmp.lt.s32.totalorder %s61_s30, %s61_s30 }
  0x19   :  { %p591_p10 = scmp.ne.s32.totalorder %s61_s30, %s590_s12  ;;  %p596_p12 = scmp.lt.s32.totalorder %s590_s12, %s590_s12 }
  0x1b   :  { %p597_p13 = por %p596_p12, %p595_p11 }
  0x1d   :  { %p598_p0 = pnand %p597_p13, %p591_p10 }
  0x1f   :  { %601 = shalt.err (!%p598_p0)
}
  0x20   :  { %66 = dma.hbm_to_vmem [thread:$0]  %s732_s8, 256, %s61_s30, [#allocation6], %s608_s22, %s608_s22, %s609_s23  }
  0x21   :  { %602 = dma.done.wait [#allocation4], 128  }
  0x22   :  { %603 = vsyncadd [#allocation4], 4294967168 }
  0x23   :  { %604 = dma.done.wait [#allocation6], 384  }
  0x24   :  { %605 = vsyncadd [#allocation6], 4294966912  ;;  %v611_v0 = vmov 0.0   ;;  %vm612_vm0 = vmmov 0   ;;  %v527_v1 = vld [vmem:[#allocation5] sm:$0xff]   ;;  %vm238_vm1 = vcmask 1040384   ;;  %v356_v47 = vstv %s734_s10 }
  0x25   :  { %480 = vmatprep.subr.bf16.mxu0 %v611_v0  ;;  %482 = vmatprep.mubr.msk.bf16.mxu0 %vm612_vm0, %v611_v0  ;;  %v528_v2 = vld [vmem:[#allocation3] sm:$0xff]   ;;  %vm103_vm2 = vcmask 130048   ;;  %vm234_vm3 = vcmask 15360   ;;  %v530_v6 = vld [vmem:[%s728_s4 + $0x8] sm:$0xff]   ;;  %vm174_vm4 = vcmask 261120   ;;  %v532_v24 = vld [vmem:[#allocation7 + $0x8] sm:$0xff]  }
  0x26   :  { %486 = vmatprep.subr.bf16.mxu1 %v611_v0  ;;  %490 = vmatprep.mubr.msk.bf16.mxu1 %vm612_vm0, %v611_v0  ;;  %v221_v3 = vld [vmem:[%s730_s6] sm:$0x1]  ;;  %v533_v26 = vld [vmem:[#allocation7] sm:$0xff]   ;;  %v613_v30 = vmov 1.0   ;;  %vm438_vm5 = vcmask 7168  }
  0x27   :  { %481 = vmatpush3.bf16.msra.mxu0 %v527_v1  ;;  %v240_v4 = vsel %vm238_vm1, %v221_v3, 0  ;;  %v529_v5 = vld [vmem:[%s725_s1] sm:$0xff]   ;;  %487 = vmatpush3.bf16.msra.mxu1 %v530_v6 }
  0x28   :  { %494 = vmatprep.subr.bf16.mxu0 %v611_v0  ;;  %v531_v7 = vld [vmem:[%s728_s4] sm:$0xff]   ;;  %488 = vmatprep.subr.bf16.mxu1 %v611_v0 }
  0x29   :  { %v447_v8 = vld [vmem:[%s727_s3] ss:$0 sm:$0xff] }
  0x2a   :  { %483 = vmatmul.mubr.msk.bf16.vlgmr.msra.gmra.mxu0 %vm103_vm2, %v528_v2  ;;  %v455_v15 = vld [vmem:[%s731_s7] ss:$0 sm:$0xff] }
  0x2b   :  { %495 = vmatpush3.bf16.msra.mxu0 %v240_v4  ;;  %496 = vmatprep.mubr.msk.bf16.mxu0 %vm612_vm0, %v611_v0  ;;  %v451_v34 = vld [vmem:[%s729_s5] ss:$0 sm:$0xff] }
  0x2c   :  { %489 = vmatpush3.bf16.msra.mxu1 %v531_v7  ;;  %508 = vmatprep.subr.mxu0 %v613_v30  ;;  %v458_v36 = vld [vmem:[%s733_s9] ss:$0 sm:$0xff] }
  0x2d   :  { %500 = vmatprep.subr.bf16.mxu1 %v611_v0 }
  0x32   :  { %497 = vmatmul.mubr.msk.bf16.vlgmr.msra.gmra.mxu0 %vm234_vm3, %v529_v5 }
  0x33   :  { %509 = vmatpush3.msra.mxu0 %v613_v30 }
  0x34   :  { %510 = vmatprep.subr.mxu0 %v613_v30 }
  0x35   :  { %511 = vmatpush3.msra.mxu0 %v613_v30 }
  0x36   :  { %512 = vmatprep.subr.mxu0 %v613_v30 }
  0x37   :  { %513 = vmatpush3.msra.mxu0 %v613_v30 }
  0x38   :  { %514 = vmatprep.subr.mxu0 %v613_v30 }
  0x39   :  { %515 = vmatpush3.msra.mxu0 %v613_v30 }
  0xea   :  { %v141_v9 = vpop.f32.mrf.mxu0 }
  0xeb   :  { %v142_v10 = vadd.f32 %v447_v8, %v141_v9 }
  0xec   :  { %v484_v11 = vpop.f32.mrf.mxu0 }
  0xed   :  { %534 = vtanh.f32 %v142_v10 }
  0xee   :  { %v144_v12 = vpop.f32.mrf.mxu0 }
  0xef   :  { %v145_v13 = vadd.f32 %v447_v8, %v144_v12 }
  0xf0   :  { %v485_v14 = vpop.f32.mrf.mxu0 }
  0xf1   :  { %536 = vtanh.f32 %v145_v13 }
  0xf2   :  { %v276_v16 = vpop.f32.mrf.mxu0 }
  0xf3   :  { %v277_v17 = vadd.f32 %v455_v15, %v276_v16 }
  0xf4   :  { %v498_v18 = vpop.f32.mrf.mxu0 }
  0xf5   :  { %538 = vtanh.f32 %v277_v17 }
  0xf6   :  { %v279_v19 = vpop.f32.mrf.mxu0 }
  0xf7   :  { %v280_v20 = vadd.f32 %v455_v15, %v279_v19 }
  0xf8   :  { %v499_v21 = vpop.f32.mrf.mxu0 }
  0xf9   :  { %540 = vtanh.f32 %v280_v20 }
  0xfa   :  { %v535_v22 = vpop.eup %534 }
  0xfe   :  { %v537_v23 = vpop.eup %536 }
  0xff   :  { %v150_v25 = vpack.c.bf16 %v537_v23, %v535_v22 }
 0x101   :  { %491 = vmatmul.mubr.msk.bf16.vlgmr.msra.gmra.mxu1 %vm174_vm4, %v150_v25 }
 0x102   :  { %501 = vmatpush3.bf16.msra.mxu1 %v532_v24  ;;  %504 = vmatprep.mubr.msk.bf16.mxu1 %vm612_vm0, %v611_v0  ;;  %v539_v27 = vpop.eup %538 }
 0x103   :  { %502 = vmatprep.subr.bf16.mxu1 %v611_v0 }
 0x106   :  { %v541_v28 = vpop.eup %540  ;;  %503 = vmatpush3.bf16.msra.mxu1 %v533_v26 }
 0x107   :  { %v285_v29 = vpack.c.bf16 %v541_v28, %v539_v27 }
 0x109   :  { %505 = vmatmul.mubr.msk.bf16.vlgmr.msra.gmra.mxu1 %vm174_vm4, %v285_v29 }
 0x1c1   :  { %v212_v31 = vpop.f32.mrf.mxu1 }
 0x1c2   :  { %v213_v38 = vadd.f32 %v451_v34, %v212_v31 }
 0x1c3   :  { %v492_v32 = vpop.f32.mrf.mxu1 }
 0x1c5   :  { %v215_v33 = vpop.f32.mrf.mxu1 }
 0x1c6   :  { %v216_v43 = vadd.f32 %v451_v34, %v215_v33 }
 0x1c7   :  { %v493_v35 = vpop.f32.mrf.mxu1 }
 0x1c9   :  { %v346_v37 = vpop.f32.mrf.mxu1 }
 0x1ca   :  { %v347_v39 = vadd.f32 %v458_v36, %v346_v37 }
 0x1cb   :  { %v506_v40 = vpop.f32.mrf.mxu1 }
 0x1cc   :  { %v353_v41 = vmul.f32 %v347_v39, %v213_v38 }
 0x1cd   :  { %v349_v42 = vpop.f32.mrf.mxu1 }
 0x1ce   :  { %v350_v44 = vadd.f32 %v458_v36, %v349_v42  ;;  %516 = vmatprep.mubr.msk.f32.mxu0 %vm174_vm4, %v353_v41 }
 0x1cf   :  { %v507_v45 = vpop.f32.mrf.mxu1 }
 0x1d0   :  { %v354_v46 = vmul.f32 %v350_v44, %v216_v43 }
 0x1d2   :  { %517 = vmatmul.mubr.msk.f32.vlgmr.msra.gmra.mxu0 %vm174_vm4, %v354_v46 }
 0x292   :  { %v518_v48 = vpop.f32.mrf.mxu0 }
 0x293   :  { %v435_v49 = vadd.f32 %v518_v48, %v356_v47 }
 0x294   :  { %v429_v50 = vpop.f32.mrf.mxu0 }
 0x295   :  { %440 = vst.msk [vmem:[%s735_s11 + $0x8] sm:$0xff] %vm438_vm5, %v435_v49  ;;  %v430_v51 = vadd.f32 %v429_v50, %v356_v47 }
 0x297   :  { %439 = vst.msk [vmem:[%s735_s11] sm:$0xff] %vm438_vm5, %v430_v51 }
 0x298   :  { %445 = vsyncpa [#allocation4], 1 }
 0x299   :  { %446 = vsyncpa [#allocation6], 1 }

</bundles_post_ra>
